<compile_context>
chip_gen: v5e
topology: v5e:2x2
jax: 0.10.0
libtpu: 0.0.40
codegen_flags: <defaults>
</compile_context>

<pallas_src>
import jax
import jax.numpy as jnp
from jax.experimental import pallas as pl
from jax.experimental.pallas import tpu as pltpu


def _compare_diff_kernel(x_ref, y_ref, wx_ref, wy_ref, b_ref, o_ref):
    # x_ref/y_ref/o_ref: (C, ts)   channel-major, spatial on the 128-lane axis.
    # wx_ref/wy_ref:     (C, C)    folded pointwise-x / pointwise-y weights.
    # b_ref:             (C, 1)    folded bias (broadcast over lanes).
    acc = jnp.dot(wx_ref[...], x_ref[...], preferred_element_type=jnp.float32)
    acc = acc + jnp.dot(wy_ref[...], y_ref[...], preferred_element_type=jnp.float32)
    o_ref[...] = (acc + b_ref[...]).astype(o_ref.dtype)


def _pick_spatial_tile(hw, max_ts):
    """Largest tile that (a) is the full extent, or (b) is a multiple of 128
    dividing hw and <= max_ts. Avoids any padding of the inputs."""
    if hw <= max_ts:
        return hw
    if hw % 128 == 0:
        for k in range(max_ts // 128, 0, -1):
            cand = 128 * k
            if hw % cand == 0:
                return cand
    # TODO(synk): ragged spatial extents (H*W not a multiple of 128 and larger
    # than max_ts) fall back to a single full-extent spatial tile; a masked
    # final tile would be better for very large odd extents.
    return hw


def compare_diff_td(x, y, conv0_w, conv0_b, pw_w, pw_b, *, max_ts=2048):
    """x, y: (N, C, H, W) float32 (NCHW, like PyTorch).

    conv0_w: (C, 1, 2, 1, 1)  depthwise Conv3d weight
    conv0_b: (C,)
    pw_w:    (C, C, 1, 1)     1x1 Conv2d weight (out, in, 1, 1)
    pw_b:    (C,)
    Returns (N, C, H, W).
    """
    N, C, H, W = x.shape
    HW = H * W
    dtype = x.dtype

    # Channel-major, spatial flattened (no transposes, no pads — free reshapes).
    xr = x.reshape(N, C, HW)
    yr = y.reshape(N, C, HW)

    # Fold the depthwise temporal-diff scales + both biases into the pointwise mix:
    #   out[o] = sum_c Wp[o,c]*(wa[c]*x[c] + wb[c]*y[c] + b0[c]) + b1[o]
    #          = (Wx @ x)[o] + (Wy @ y)[o] + b'[o]
    wa = conv0_w[:, 0, 0, 0, 0]                       # (C,) multiplies x
    wb = conv0_w[:, 0, 1, 0, 0]                       # (C,) multiplies y
    wp = pw_w[:, :, 0, 0]                             # (C_out, C_in)
    wx = (wp * wa[None, :]).astype(dtype)             # (C, C)
    wy = (wp * wb[None, :]).astype(dtype)             # (C, C)
    bias = (wp @ conv0_b + pw_b).reshape(C, 1).astype(dtype)

    ts = _pick_spatial_tile(HW, max_ts)
    grid = (N, HW // ts)

    row_spec = pl.BlockSpec((None, C, ts), lambda n, s: (n, 0, s))
    mat_spec = pl.BlockSpec((C, C), lambda n, s: (0, 0))
    bias_spec = pl.BlockSpec((C, 1), lambda n, s: (0, 0))

    out = pl.pallas_call(
        _compare_diff_kernel,
        out_shape=jax.ShapeDtypeStruct((N, C, HW), dtype),
        grid_spec=pltpu.PrefetchScalarGridSpec(
            num_scalar_prefetch=0,
            grid=grid,
            in_specs=[row_spec, row_spec, mat_spec, mat_spec, bias_spec],
            out_specs=row_spec,
        ),
        compiler_params=pltpu.CompilerParams(
            dimension_semantics=("parallel", "parallel")
        ),
    )(xr, yr, wx, wy, bias)

    return out.reshape(N, C, H, W)


def _reference(x, y, conv0_w, conv0_b, pw_w, pw_b):
    """Pure-JAX reference of the PyTorch forward (td=True, k=1, k2=0)."""
    wa = conv0_w[:, 0, 0, 0, 0][None, :, None, None]
    wb = conv0_w[:, 0, 1, 0, 0][None, :, None, None]
    z = x * wa + y * wb + conv0_b[None, :, None, None]
    out = jnp.einsum("oc,nchw->nohw", pw_w[:, :, 0, 0], z) + pw_b[None, :, None, None]
    return out


if __name__ == "__main__":
    key = jax.random.PRNGKey(0)
    k_x, k_y, k_w0, k_b0, k_wp, k_bp = jax.random.split(key, 6)

    N, C, H, W = 2, 4, 16, 16  # batch=2, dim=4, spatial=16

    x = jax.random.normal(k_x, (N, C, H, W), dtype=jnp.float32)
    y = jax.random.normal(k_y, (N, C, H, W), dtype=jnp.float32)

    # Deterministic synthetic parameters matching PyTorch shapes.
    conv0_w = jax.random.normal(k_w0, (C, 1, 2, 1, 1), dtype=jnp.float32) * 0.1
    conv0_b = jax.random.normal(k_b0, (C,), dtype=jnp.float32) * 0.1
    pw_w = jax.random.normal(k_wp, (C, C, 1, 1), dtype=jnp.float32) * 0.1
    pw_b = jax.random.normal(k_bp, (C,), dtype=jnp.float32) * 0.1

    out = compare_diff_td(x, y, conv0_w, conv0_b, pw_w, pw_b)
    out = jax.block_until_ready(out)

    ref = _reference(x, y, conv0_w, conv0_b, pw_w, pw_b)
    assert out.shape == (N, C, H, W)
    assert jnp.allclose(out, ref, atol=1e-5, rtol=1e-5), "mismatch vs reference"

    # TODO(synk): k>1 (spatial depthwise taps) and k2>0 (conv1 + ReLU) branches
    # are not exercised by the default config; only the k=1/k2=0 path is
    # implemented here.
    print("KERNEL_OK")
</pallas_src>

<mosaic_0001>
module attributes {stable_mosaic.version = 11 : i64} {
  func.func @_compare_diff_kernel(%arg0: i32, %arg1: i32, %arg2: memref<1x4x256xf32, #tpu.memory_space<vmem>>, %arg3: memref<1x4x256xf32, #tpu.memory_space<vmem>>, %arg4: memref<4x4xf32, #tpu.memory_space<vmem>>, %arg5: memref<4x4xf32, #tpu.memory_space<vmem>>, %arg6: memref<4x1xf32, #tpu.memory_space<vmem>>, %arg7: memref<1x4x256xf32, #tpu.memory_space<vmem>>) attributes {dimension_semantics = [#tpu.dimension_semantics<parallel>, #tpu.dimension_semantics<parallel>], iteration_bounds = array<i64: 2, 1>, scalar_prefetch = 0 : i64, scratch_operands = 0 : i64, tpu.core_type = #tpu.core_type<tc>, window_params = [{transform_indices = @transform_0, window_bounds = array<i64: 1, 4, 256>}, {transform_indices = @transform_1, window_bounds = array<i64: 1, 4, 256>}, {pipeline_mode = #tpu.pipeline_mode<synchronous>, transform_indices = @transform_2, window_bounds = array<i64: 4, 4>}, {pipeline_mode = #tpu.pipeline_mode<synchronous>, transform_indices = @transform_3, window_bounds = array<i64: 4, 4>}, {pipeline_mode = #tpu.pipeline_mode<synchronous>, transform_indices = @transform_4, window_bounds = array<i64: 4, 1>}, {transform_indices = @transform_5, window_bounds = array<i64: 1, 4, 256>}]} {
    %c0 = arith.constant 0 : index
    %c0_0 = arith.constant 0 : index
    %0 = vector.load %arg4[%c0, %c0_0] : memref<4x4xf32, #tpu.memory_space<vmem>>, vector<4x4xf32>
    %c0_1 = arith.constant 0 : index
    %c0_2 = arith.constant 0 : index
    %c0_3 = arith.constant 0 : index
    %1 = vector.load %arg2[%c0_1, %c0_2, %c0_3] : memref<1x4x256xf32, #tpu.memory_space<vmem>>, vector<1x4x256xf32>
    %2 = vector.shape_cast %1 : vector<1x4x256xf32> to vector<4x256xf32>
    %cst = arith.constant dense<0.000000e+00> : vector<4x256xf32>
    %3 = tpu.matmul %0, %2, %cst {dimension_numbers = #tpu.dot_dimension_numbers<[1], [0], [0], [1], [0, 0, 1, 1], [], []>} : vector<4x4xf32>, vector<4x256xf32>, vector<4x256xf32> -> vector<4x256xf32>
    %c0_4 = arith.constant 0 : index
    %c0_5 = arith.constant 0 : index
    %4 = vector.load %arg5[%c0_4, %c0_5] : memref<4x4xf32, #tpu.memory_space<vmem>>, vector<4x4xf32>
    %c0_6 = arith.constant 0 : index
    %c0_7 = arith.constant 0 : index
    %c0_8 = arith.constant 0 : index
    %5 = vector.load %arg3[%c0_6, %c0_7, %c0_8] : memref<1x4x256xf32, #tpu.memory_space<vmem>>, vector<1x4x256xf32>
    %6 = vector.shape_cast %5 : vector<1x4x256xf32> to vector<4x256xf32>
    %cst_9 = arith.constant dense<0.000000e+00> : vector<4x256xf32>
    %7 = tpu.matmul %4, %6, %cst_9 {dimension_numbers = #tpu.dot_dimension_numbers<[1], [0], [0], [1], [0, 0, 1, 1], [], []>} : vector<4x4xf32>, vector<4x256xf32>, vector<4x256xf32> -> vector<4x256xf32>
    %8 = arith.addf %3, %7 : vector<4x256xf32>
    %c0_10 = arith.constant 0 : index
    %c0_11 = arith.constant 0 : index
    %9 = vector.load %arg6[%c0_10, %c0_11] : memref<4x1xf32, #tpu.memory_space<vmem>>, vector<4x1xf32>
    %10 = vector.broadcast %9 : vector<4x1xf32> to vector<4x256xf32>
    %11 = arith.addf %8, %10 : vector<4x256xf32>
    %c0_12 = arith.constant 0 : index
    %c0_13 = arith.constant 0 : index
    %c0_14 = arith.constant 0 : index
    %12 = vector.load %arg7[%c0_12, %c0_13, %c0_14] : memref<1x4x256xf32, #tpu.memory_space<vmem>>, vector<1x4x256xf32>
    %13 = vector.shape_cast %12 : vector<1x4x256xf32> to vector<4x256xf32>
    %14 = vector.shape_cast %11 : vector<4x256xf32> to vector<1x4x256xf32>
    tpu.vector_store %arg7[%c0_12, %c0_13, %c0_14], %14 {strides = array<i32>} : memref<1x4x256xf32, #tpu.memory_space<vmem>>, vector<1x4x256xf32>,
    return
  }
  func.func @transform_0(%arg0: i32, %arg1: i32) -> (i32, i32, i32) {
    %c0_i32 = arith.constant 0 : i32
    %c0_i32_0 = arith.constant 0 : i32
    return %arg0, %c0_i32, %arg1 : i32, i32, i32
  }
  func.func @transform_1(%arg0: i32, %arg1: i32) -> (i32, i32, i32) {
    %c0_i32 = arith.constant 0 : i32
    %c0_i32_0 = arith.constant 0 : i32
    return %arg0, %c0_i32, %arg1 : i32, i32, i32
  }
  func.func @transform_2(%arg0: i32, %arg1: i32) -> (i32, i32) {
    %c0_i32 = arith.constant 0 : i32
    %c0_i32_0 = arith.constant 0 : i32
    %c0_i32_1 = arith.constant 0 : i32
    return %c0_i32, %c0_i32_0 : i32, i32
  }
  func.func @transform_3(%arg0: i32, %arg1: i32) -> (i32, i32) {
    %c0_i32 = arith.constant 0 : i32
    %c0_i32_0 = arith.constant 0 : i32
    %c0_i32_1 = arith.constant 0 : i32
    return %c0_i32, %c0_i32_0 : i32, i32
  }
  func.func @transform_4(%arg0: i32, %arg1: i32) -> (i32, i32) {
    %c0_i32 = arith.constant 0 : i32
    %c0_i32_0 = arith.constant 0 : i32
    %c0_i32_1 = arith.constant 0 : i32
    return %c0_i32, %c0_i32_0 : i32, i32
  }
  func.func @transform_5(%arg0: i32, %arg1: i32) -> (i32, i32, i32) {
    %c0_i32 = arith.constant 0 : i32
    %c0_i32_0 = arith.constant 0 : i32
    return %arg0, %c0_i32, %arg1 : i32, i32, i32
  }
}

</mosaic_0001>

<bundles_post_ra>
// kernel: tpu_custom_call.1
= control target key start
LH: loop header
LB: loop body
LE: loop exit
PB: predicated region body
PF: predicated region fallthrough
CT: control target
= control target key end

     0   :  { %s1078_s0 = inlined_call_operand.hbm [shape: f32[2,4,256], index: 0, kind: input, shape index: {}]   ;;  %s1079_s1 = inlined_call_operand.hbm [shape: f32[2,4,256], index: 1, kind: input, shape index: {}]   ;;  %s1080_s2 = inlined_call_operand.vmem [shape: f32[4,4], index: 2, kind: input, shape index: {}]   ;;  %s1081_s3 = inlined_call_operand.hbm [shape: f32[4,4], index: 3, kind: input, shape index: {}]   ;;  %s1082_s4 = inlined_call_operand.vmem [shape: f32[4,1], index: 4, kind: input, shape index: {}]   ;;  %s1083_s5 = inlined_call_operand.hbm [shape: f32[2,4,256], index: 5, kind: output, shape index: {}]  }
   0x1   :  { %1088 = sst [smem:[#allocation18_spill]] %s1081_s3 }
   0x2   :  { %10 = vsyncpa [#allocation3], 0 }
   0x3   :  { %12 = vsyncpa [#allocation3 + $0x1], 0 }
   0x4   :  { %13 = vsyncpa [#allocation6], 0 }
   0x5   :  { %15 = vsyncpa [#allocation6 + $0x1], 0 }
   0x6   :  { %16 = vsyncpa [#allocation4], 0 }
   0x7   :  { %18 = vsyncpa [#allocation4 + $0x1], 0  ;;  %s908_s18 = smov 0   ;;  %s910_s19 = smov 0  }
   0x8   :  { %s912_s20 = smov 0   ;;  %s914_s21 = smov 0  }
   0x9   :  { %s916_s22 = smov 0   ;;  %s918_s23 = smov 0  }
   0xa LB: > { %1089 = sst [smem:[#allocation13_spill]] %s854_s18  ;;  %s939_s24 = sadd.s32 4294967295, %s874_s23   ;;  %s874_s23 = sphi %s918_s23, %s24_s23   ;;  %s870_s22 = sphi %s916_s22, %s1104_s22   ;;  %s866_s21 = sphi %s914_s21, %s1103_s21   ;;  %s862_s20 = sphi %s912_s20, %s1107_s20   ;;  %s858_s19 = sphi %s910_s19, %s1106_s19   ;;  %s854_s18 = sphi %s908_s18, %s1105_s18  }
   0xb   : > { %1090 = sst [smem:[#allocation14_spill]] %s870_s22  ;;  %s583_s25 = sadd.s32 4294967294, %s874_s23  }
   0xc   : > { %p58_p0 = scmp.ne.s32.totalorder %s858_s19, %s854_s18  ;;  %p59_p1 = scmp.eq.s32.totalorder %s939_s24, 0 }
   0xd   : > { %p175_p2 = scmp.eq.s32.totalorder %s939_s24, 1  ;;  %p181_p3 = scmp.eq.s32.totalorder %s583_s25, 1 }
   0xe   : > { %p948_p4 = por %p59_p1, %p58_p0  ;;  %p584_p5 = scmp.ge.s32.totalorder %s874_s23, 1 }
   0xf   : > { %p953_p6 = por %p181_p3, %p58_p0  ;;  %p188_p7 = scmp.lt.s32.totalorder %s874_s23, 3 }
  0x10   : > { %s1094_s3 = sld [smem:[#allocation18_spill]]  ;;  %p586_p9 = scmp.ge.s32.totalorder %s874_s23, 2 }
  0x11   : > { %s1092_s27 = scalar_select %p953_p6, 1, 0 }
  0x12   : > { %p961_p8 = pnand %p584_p5, %p188_p7  ;;  %s876_s7 = smov [#allocation7]  }
  0x13   : > { %1093 = sst [smem:[#allocation15_spill]] %s1092_s27  ;;  %s205_s8 = sshll.u32 %s876_s7, 4  ;;  %s206_s8 = int_to_ptr.vmem [resolvable:$true] %s205_s8 }
  0x14   : > { %p624_p10 = pneg %p961_p8  ;;  %s36_s9 = sadd.s32 1, %s870_s22 }
  0x15   : > { %p38_p12 = scmp.ge.s32.totalorder %s36_s9, 2  ;;  %s45_s10 = sadd.s32 1, %s862_s20 }
  0x16   : > { %s203_s30 = sshll.u32 %s1094_s3, 4  ;;  %p625_p11 = pnand %p624_p10, %p59_p1  ;;  %s204_s30 = int_to_ptr.hbm [resolvable:$true] %s203_s30 }
  0x17   : > { %p52_p13 = scmp.ne.s32.totalorder %s862_s20, %s858_s19  ;;  %p53_p0 = scmp.eq.s32.totalorder %s874_s23, 0 }
  0x18   : > { %627 = dma.hbm_to_vmem [thread:$0]  (!%p625_p11), %s204_s30, 64, %s206_s8, [#allocation6]  }
  0x19   : > { %s1109_s9 = smov (%p38_p12, %s36_s9), 0  ;;  %p977_p3 = por %p53_p0, %p52_p13 }
  0x1a   : > { %1096 = sst [smem:[#allocation16_spill]] %s1109_s9  ;;  %p983_p5 = por %p175_p2, %p52_p13 }
  0x1b   : > { %s40_s13 = ssub.s32 %s870_s22, %s1109_s9  ;;  %p640_p7 = scmp.lt.s32.totalorder %s874_s23, 2 }
  0x1c   : > { %p43_p10 = scmp.eq.s32.totalorder %s40_s13, 0  ;;  %s219_s14 = sand.u32 1, %s862_s20  }
  0x1d   : > { %s587_s15 = sshll.u32 %s219_s14, 3  ;;  %s611_s17 = sshll.u32 %s870_s22, 3 }
  0x1e   : > { %s992_s16 = scalar_select %p43_p10, %s862_s20, %s45_s10  }
  0x1f   : > { %s230_s29 = scalar_lea.hbm %s1078_s0, %s611_s17  ;;  %s223_s30 = scalar_lea.vmem [#allocation2], %s587_s15 }
  0x20   : > { %1099 = sst [smem:[#allocation17_spill]] %s992_s16  ;;  %s234_s7 = sshll.u32 %s223_s30, 4  ;;  %s235_s7 = int_to_ptr.vmem [resolvable:$true] %s234_s7 }
  0x21   : > { %s232_s8 = sshll.u32 %s230_s29, 4  ;;  %p629_p2 = pnand %p640_p7, %p977_p3  ;;  %s233_s8 = int_to_ptr.hbm [resolvable:$true] %s232_s8 }
  0x22   : > { %s252_s13 = scalar_lea.hbm %s1079_s1, %s611_s17  ;;  %s241_s27 = sand.u32 1, %s874_s23  }
  0x23   : > { %s220_s18 = scalar_lea.sflag [#allocation3], %s219_s14  ;;  %s254_s10 = sshll.u32 %s252_s13, 4  ;;  %s255_s10 = int_to_ptr.hbm [resolvable:$true] %s254_s10 }
  0x24   : > { %631 = dma.hbm_to_vmem [thread:$0]  (!%p629_p2), %s233_s8, 128, %s235_s7, %s220_s18  }
  0x25   : > { %s245_s22 = scalar_lea.vmem [#allocation5], %s587_s15  ;;  %s242_s25 = scalar_lea.sflag [#allocation6], %s241_s27 }
  0x26   : > { %s256_s16 = sshll.u32 %s245_s22, 4  ;;  %265 = sbr.rel (%p961_p8) target bundleno = 209 (0xd1), region = 40  ;;  %s257_s16 = int_to_ptr.vmem [resolvable:$true] %s256_s16 }
  0x27   : > { %634 = dma.hbm_to_vmem [thread:$0]  (!%p629_p2), %s255_s10, 128, %s257_s16, %s242_s25  }
  0x28   : > { %s1007_s11 = sand.u32 (!%p961_p8), 1, %s858_s19  }
  0x29   : > { %s1010_s3 = sshll.u32 (!%p961_p8), %s1007_s11, 3  ;;  %s268_s18 = scalar_lea.sflag (!%p961_p8), [#allocation3], %s1007_s11 }
  0x2a   : > { %s271_s9 = scalar_lea.vmem (!%p961_p8), [#allocation2], %s1010_s3 }
  0x2b   : > { %837 = dma.done.wait (%p948_p4), %s268_s18, 128  }
  0x2c   : > { %839 = vsyncadd (%p948_p4), %s268_s18, 4294967168  ;;  %s277_s22 = sand.u32 1, %s939_s24   ;;  %s281_s6 = scalar_lea.vmem [#allocation5], %s1010_s3 }
  0x2d   : > { %s278_s27 = scalar_lea.sflag [#allocation6], %s277_s22 }
  0x2e   : > { %841 = dma.done.wait (%p948_p4), %s278_s27, 128  }
  0x2f   : > { %843 = vsyncadd (%p948_p4), %s278_s27, 4294967168 }
  0x30   : > { %845 = dma.done.wait (%p59_p1), [#allocation6], 64  }
  0x31   : > { %847 = vsyncadd (%p59_p1), [#allocation6], 4294967232  ;;  %v877_v0 = vmov 0   ;;  %v325_v1 = vld [vmem:[%s281_s6] sm:$0xff]  ;;  %v323_v3 = vld [vmem:[%s271_s9] sm:$0xff]  ;;  %vm334_vm0 = vcmask 1043456  }
  0x32   : > { %693 = vset.pattern.permute.xlu0 %v877_v0  ;;  %327 = vst [vmem:[#allocation1] ss:$2 sm:$0xff] %v325_v1  ;;  %v430_v2 = vld [vmem:[%s1082_s4] sm:$0xf]  ;;  %v324_v4 = vld [vmem:[#allocation7] sm:$0xf] }
  0x33   : > { %433 = vperm.xlu0 %693, %v430_v2   ;;  %vm330_vm1 = vcmask 31744   ;;  %v322_v7 = vld [vmem:[%s1080_s2] sm:$0xf]  ;;  %s613_s16 = sshll.u32 %s866_s21, 3  ;;  %s318_s30 = scalar_lea.vmem [#allocation8], %s1010_s3 }
  0x34   : > { %s458_s29 = scalar_lea.hbm %s1083_s5, %s613_s16  ;;  %s460_s7 = sshll.u32 %s318_s30, 4  ;;  %s461_s7 = int_to_ptr.vmem [resolvable:$true] %s460_s7 }
  0x35   : > { %s462_s8 = sshll.u32 %s458_s29, 4  ;;  %s445_s21 = scalar_lea.sflag [#allocation4], %s1007_s11  ;;  %s463_s8 = int_to_ptr.hbm [resolvable:$true] %s462_s8 }
  0x36   : > { %s798_s13 = sshra.s32 %s463_s8, 4  ;;  %s804_s3 = scalar_lea.hbm %s1083_s5, 16  ;;  %s799_s13 = int_to_ptr.hbm [resolvable:$true] %s798_s13 }
  0x37   : > { %s800_s10 = scalar_lea.hbm %s799_s13, 8  ;;  %p805_p11 = scmp.lt.s32.totalorder %s799_s13, %s1083_s5 }
  0x38   : > { %p801_p1 = scmp.ne.s32.totalorder %s799_s13, %s800_s10  ;;  %p806_p12 = scmp.lt.s32.totalorder %s804_s3, %s800_s10 }
  0x39   : > { %v328_v5 = vld.sshfl [vmem:[#allocation1] sm:$0xff pattern:$0x75316420]  ;;  %v329_v6 = vld.sshfl [vmem:[#allocation1 + $0x8] sm:$0xff pattern:$0x75316420] }
  0x3a   : > { %380 = vst [vmem:[#allocation1] ss:$2 sm:$0xff] %v323_v3  ;;  %598 = vmatpush.msk.msra.mxu0 %vm334_vm0, %v328_v5  ;;  %600 = vmatpush.msk.msra.mxu1 %vm334_vm0, %v329_v6  ;;  %p802_p4 = pnand %p801_p1, %p983_p5  ;;  %p807_p13 = por %p806_p12, %p805_p11 }
  0x3b   : > { %599 = vmatmul.msk.f32.vlgmr.msra.gmra.mxu0 %vm330_vm1, %v324_v4  ;;  %601 = vmatmul.msk.f32.vlgmr.msra.gmra.mxu1 %vm330_vm1, %v324_v4 }
  0x3c   : > { %p803_p8 = pneg %p802_p4 }
  0x3e   : > { %p808_p0 = pnand %p807_p13, %p803_p8 }
  0x41   : > { %v381_v8 = vld.sshfl [vmem:[#allocation1] sm:$0xff pattern:$0x75316420]  ;;  %v382_v9 = vld.sshfl [vmem:[#allocation1 + $0x8] sm:$0xff pattern:$0x75316420] }
  0x42   : > { %602 = vmatpush.msk.msra.mxu2 %vm334_vm0, %v381_v8  ;;  %604 = vmatpush.msk.msra.mxu3 %vm334_vm0, %v382_v9 }
  0x43   : > { %603 = vmatmul.msk.f32.vlgmr.msra.gmra.mxu2 %vm330_vm1, %v322_v7  ;;  %605 = vmatmul.msk.f32.vlgmr.msra.gmra.mxu3 %vm330_vm1, %v322_v7 }
  0xa5   : > { %v434_v12 = vpop.permute.xlu0 %433 }
  0xb8   : > { %v356_v10 = vpop.f32.mrf.mxu0  ;;  %v376_v11 = vpop.f32.mrf.mxu1 }
  0xc6   : > { %v407_v13 = vpop.f32.mrf.mxu2  ;;  %v427_v14 = vpop.f32.mrf.mxu3 }
  0xc7   : > { %v408_v15 = vadd.f32 %v407_v13, %v356_v10  ;;  %v428_v16 = vadd.f32 %v427_v14, %v376_v11 }
  0xc9   : > { %v437_v17 = vadd.f32 %v434_v12, %v428_v16  ;;  %v436_v18 = vadd.f32 %v434_v12, %v408_v15 }
  0xcb   : > { %v440_v19 = vrot.slane %v437_v17, 4 }
  0xcd   : > { %v441_v20 = vsel %vm334_vm0, %v436_v18, %v440_v19 }
  0xce   : > { %443 = vst [vmem:[%s318_s30] sm:$0xff] %v441_v20 }
  0xcf   : > { %811 = shalt.err (!%p808_p0)
}
  0xd0   : > { %622 = dma.vmem_to_hbm [thread:$0]  (%p983_p5), %s461_s7, 128, %s463_s8, %s445_s21  }
  0xd1 PF: > { %s1100_s11 = sld [smem:[#allocation13_spill]]  ;;  %p636_p3 = pnand %p586_p9, %p953_p6 }
  0xd3   : > { %p637_p7 = pneg %p636_p3 }
  0xd7   : > { %s474_s6 = sand.u32 1, %s1100_s11  }
  0xd8   : > { %s475_s14 = scalar_lea.sflag [#allocation4], %s474_s6 }
  0xd9   : > { %849 = dma.done.wait (%p637_p7), %s475_s14, 128  }
  0xda   : > { %851 = vsyncadd (%p637_p7), %s475_s14, 4294967168  ;;  %s24_s23 = sadd.s32 1, %s874_s23   ;;  %s1102_s15 = sld [smem:[#allocation17_spill]] }
  0xdb   : > { %p21_p10 = scmp.ge.s32.totalorder %s24_s23, 4   ;;  %s1103_s21 = sld [smem:[#allocation14_spill]] }
  0xdc   : > { %s1104_s22 = sld [smem:[#allocation16_spill]]  ;;  %s1105_s18 = smov %s858_s19 }
  0xdd   : > { %s1106_s19 = smov %s862_s20  ;;  %23 = sbr.rel (!%p21_p10) target bundleno = 10 (0xa), region = 102 }
  0xe0   : > { %s1107_s20 = smov %s1102_s15 }
  0xe2   :  { %481 = vsyncpa [#allocation3], 1 }
  0xe3   :  { %483 = vsyncpa [#allocation3 + $0x1], 1 }
  0xe4   :  { %484 = vsyncpa [#allocation6], 1 }
  0xe5   :  { %486 = vsyncpa [#allocation6 + $0x1], 1 }
  0xe6   :  { %487 = vsyncpa [#allocation4], 1 }
  0xe7   :  { %489 = vsyncpa [#allocation4 + $0x1], 1 }

</bundles_post_ra>
